<compile_context>
chip_gen: v5e
topology: v5e:2x2
jax: 0.10.0
libtpu: 0.0.40
codegen_flags: <defaults>
</compile_context>

<pallas_src>
import math
from functools import partial

import jax
import jax.numpy as jnp
from jax import lax
from jax.experimental import pallas as pl
from jax.experimental.pallas import tpu as pltpu


def get_points_from_angles(distance, elevation, azimuth, degrees=True):
    """Same convention as nr.get_points_from_angles (scalar Python version)."""
    if degrees:
        elevation = math.radians(elevation)
        azimuth = math.radians(azimuth)
    return (
        distance * math.cos(elevation) * math.sin(azimuth),
        distance * math.sin(elevation),
        -distance * math.cos(elevation) * math.cos(azimuth),
    )


# ----------------------------------------------------------------------------
# Single fused kernel:
#   tanh(textures) -> per-channel texture means -> placeholder "render" for
#   both camera views -> two-sided squared-error loss.
#
#   tex_ref  : (8, cols) f32 lane-dense flat view of (zero-padded) textures;
#              cols % 3 == 0 so channel id == lane % 3.
#   refs_ref : (6, HW)   f32, stacked [image_ref, image_ref_flip] with the
#              texture-independent render terms already subtracted at setup;
#              row % 3 == channel.
#   loss_ref : (1, 1)    f32 scalar in SMEM.
# ----------------------------------------------------------------------------
def _fused_loss_kernel(tex_ref, refs_ref, loss_ref, *, n_tex):
    # tanh(self.textures) on the EUP, kept entirely in VMEM/registers.
    t = jnp.tanh(tex_ref[...])                                   # (8, cols)

    # Per-channel means: reduce over sublanes FIRST, then mask a single row.
    col = jnp.sum(t, axis=0, keepdims=True)                      # (1, cols)
    ch = lax.broadcasted_iota(jnp.int32, col.shape, 1) % 3
    zero = jnp.zeros_like(col)
    inv_cnt = 3.0 / n_tex                                        # per-channel count = n_tex/3
    m0 = jnp.sum(jnp.where(ch == 0, col, zero)) * inv_cnt
    m1 = jnp.sum(jnp.where(ch == 1, col, zero)) * inv_cnt
    m2 = jnp.sum(jnp.where(ch == 2, col, zero)) * inv_cnt

    # TODO(synk): the real nr.Renderer rasterization (projection, z-buffer,
    # texture sampling) has no Pallas equivalent; the placeholder render
    # img[v,c,p] = mean_c(tanh(tex)) + off[v,c] + ramp[p] stands in for it,
    # and its texture-independent terms (off + ramp) were folded into
    # refs_ref at setup, so (image - reference) reduces to mean_c - refs_adj.
    rch = lax.broadcasted_iota(jnp.int32, refs_ref.shape, 0) % 3  # (6, HW)
    mean_full = jnp.where(rch == 0, m0, jnp.where(rch == 1, m1, m2))
    d = mean_full - refs_ref[...]

    # loss = ( sum((img1 - ref)^2) + sum((img2 - ref_flip)^2) ) / 2
    loss_ref[0, 0] = 0.5 * jnp.sum(d * d)


# TODO(synk): jax.grad does not trace through pl.pallas_call; training the
# `textures` parameter requires wrapping this forward in jax.custom_vjp with a
# matching (pure-JAX or Pallas) backward.
@jax.jit
def renderer_model_forward(textures, refs_adj):
    """Per-step forward: a single fused Pallas call producing the scalar loss.

    textures : (1, F, T, T, T, 3) f32 trainable parameter
    refs_adj : (6, H*W) f32 constant, [image_ref; image_ref_flip] with the
               per-view constant offset and placeholder ramp pre-subtracted.
    """
    n = textures.size
    n_pad = ((n + 23) // 24) * 24          # multiple of 8 rows * (cols % 3 == 0)
    flat = textures.reshape(-1)
    if n_pad != n:                          # static at trace time
        flat = jnp.concatenate([flat, jnp.zeros((n_pad - n,), flat.dtype)])
    tex2d = flat.reshape(8, n_pad // 8)     # free row-major, lane-dense view

    loss = pl.pallas_call(
        partial(_fused_loss_kernel, n_tex=n),
        out_shape=jax.ShapeDtypeStruct((1, 1), jnp.float32),
        in_specs=[pl.BlockSpec(memory_space=pltpu.VMEM),
                  pl.BlockSpec(memory_space=pltpu.VMEM)],
        out_specs=pl.BlockSpec(memory_space=pltpu.SMEM),
    )(tex2d, refs_adj)
    return loss[0, 0]


if __name__ == "__main__":
    key = jax.random.PRNGKey(0)
    k1, k2, k3, k4 = jax.random.split(key, 4)

    # Small synthetic mesh: V=8 vertices, F=12 faces, texture_size=6, 16x16 image.
    V, F_, T = 8, 12, 6
    H = W = 16
    HW = H * W

    vertices = jax.random.normal(k1, (1, V, 3), dtype=jnp.float32)
    faces = jax.random.randint(k2, (1, F_, 3), 0, V, dtype=jnp.int32)  # unused by the stand-in render

    # Module init uses zeros(1,F,T,T,T,3); small random values make tanh non-trivial.
    textures = 0.1 * jax.random.normal(k3, (1, F_, T, T, T, 3), dtype=jnp.float32)

    # Reference image (NCHW) and its horizontal flip, like the PyTorch buffers.
    image_ref_np = jax.random.uniform(k4, (H, W, 3), dtype=jnp.float32)
    image_ref = jnp.transpose(image_ref_np, (2, 0, 1))[None, :]                   # (1,3,H,W)
    image_ref_flip = jnp.transpose(image_ref_np[:, ::-1, :], (2, 0, 1))[None, :]  # (1,3,H,W)

    symmetric_camera = [0.0, 0.0, 0.0]

    # ---- One-time setup (module __init__ equivalent): hoist every per-call
    #      constant so the per-step forward is a single 2-input kernel launch. ----
    eye_one = jnp.asarray(get_points_from_angles(2.732, 0.0, 0.0), dtype=jnp.float32)
    eye_sym = jnp.asarray(symmetric_camera, dtype=jnp.float32)
    vert_mean = jnp.mean(vertices, axis=(0, 1))                                   # (3,)
    off = 0.01 * vert_mean[None, :] + 0.001 * jnp.stack([eye_one, eye_sym])       # (2,3)
    ramp = 0.05 * jnp.linspace(0.0, 1.0, HW, dtype=jnp.float32)                   # (HW,)

    refs_raw = jnp.concatenate([image_ref, image_ref_flip], axis=0).reshape(2, 3, HW)
    # Fold the texture-independent placeholder-render terms into the reference
    # images once, and merge (view, channel) -> 6 sublanes for the loss pass.
    refs_adj = (refs_raw - off[:, :, None] - ramp[None, None, :]).reshape(6, HW)
    refs_adj = refs_adj.astype(jnp.float32)

    # ---- Run fused Pallas forward ----
    loss = renderer_model_forward(textures, refs_adj)
    jax.block_until_ready(loss)
    assert loss.shape == () and loss.dtype == jnp.float32

    # ---- Pure-JAX reference of the same placeholder forward (sanity check) ----
    def _ref_forward(tex):
        t = jnp.tanh(tex)
        tex_mean = jnp.mean(t.reshape(-1, 3), axis=0)                             # (3,)

        def render(eye):
            base = tex_mean + 0.01 * vert_mean + 0.001 * eye
            return base[:, None] + ramp[None, :]

        l1 = jnp.sum((render(eye_one) - refs_raw[0]) ** 2)
        l2 = jnp.sum((render(eye_sym) - refs_raw[1]) ** 2)
        return (l1 + l2) / 2

    ref_loss = _ref_forward(textures)
    assert jnp.allclose(loss, ref_loss, rtol=1e-3, atol=1e-3), (loss, ref_loss)

    print("KERNEL_OK")
</pallas_src>

<mosaic_0001>
module attributes {stable_mosaic.version = 11 : i64} {
  func.func @_fused_loss_kernel(%arg0: memref<8x972xf32, #tpu.memory_space<vmem>>, %arg1: memref<6x256xf32, #tpu.memory_space<vmem>>, %arg2: memref<1x1xf32, #tpu.memory_space<smem>>) attributes {dimension_semantics = [], scalar_prefetch = 0 : i64, scratch_operands = 0 : i64, tpu.core_type = #tpu.core_type<tc>} {
    %c0 = arith.constant 0 : index
    %c0_0 = arith.constant 0 : index
    %0 = vector.load %arg0[%c0, %c0_0] : memref<8x972xf32, #tpu.memory_space<vmem>>, vector<8x972xf32>
    %1 = math.tanh %0 : vector<8x972xf32>
    %cst = arith.constant dense<0.000000e+00> : vector<972xf32>
    %2 = vector.multi_reduction <add>, %1, %cst [0] : vector<8x972xf32> to vector<972xf32>
    %3 = vector.shape_cast %2 : vector<972xf32> to vector<1x972xf32>
    %4 = tpu.iota {dimensions = array<i32: 1>} : vector<1x972xi32>
    %c3_i32 = arith.constant 3 : i32
    %c0_i32 = arith.constant 0 : i32
    %5 = arith.cmpi eq, %c3_i32, %c0_i32 : i32
    %c1_i32 = arith.constant 1 : i32
    %6 = arith.select %5, %c1_i32, %c3_i32 : i32
    %7 = vector.broadcast %6 : i32 to vector<1x972xi32>
    %8 = arith.remsi %4, %7 : vector<1x972xi32>
    %c0_i32_1 = arith.constant 0 : i32
    %9 = vector.broadcast %c0_i32_1 : i32 to vector<1x972xi32>
    %10 = arith.cmpi ne, %8, %9 : vector<1x972xi32>
    %c0_i32_2 = arith.constant 0 : i32
    %11 = vector.broadcast %c0_i32_2 : i32 to vector<1x972xi32>
    %12 = arith.cmpi slt, %8, %11 : vector<1x972xi32>
    %c0_i32_3 = arith.constant 0 : i32
    %13 = arith.cmpi slt, %6, %c0_i32_3 : i32
    %14 = vector.broadcast %13 : i1 to vector<1x972xi1>
    %15 = vector.broadcast %14 : vector<1x972xi1> to vector<1x972xi1>
    %16 = arith.xori %12, %15 : vector<1x972xi1>
    %17 = arith.andi %16, %10 : vector<1x972xi1>
    %18 = vector.broadcast %6 : i32 to vector<1x972xi32>
    %19 = arith.addi %8, %18 : vector<1x972xi32>
    %20 = arith.select %17, %19, %8 : vector<1x972xi1>, vector<1x972xi32>
    %cst_4 = arith.constant 0.000000e+00 : f32
    %21 = vector.broadcast %cst_4 : f32 to vector<1x972xf32>
    %c0_i32_5 = arith.constant 0 : i32
    %22 = vector.broadcast %c0_i32_5 : i32 to vector<1x972xi32>
    %23 = arith.cmpi eq, %20, %22 : vector<1x972xi32>
    %24 = arith.select %23, %3, %21 : vector<1x972xi1>, vector<1x972xf32>
    %25 = vector.shape_cast %24 : vector<1x972xf32> to vector<1x1x972xf32>
    %cst_6 = arith.constant dense<0.000000e+00> : vector<1xf32>
    %26 = vector.multi_reduction <add>, %25, %cst_6 [1, 2] : vector<1x1x972xf32> to vector<1xf32>
    %27 = vector.shape_cast %26 : vector<1xf32> to vector<1x1x1xf32>
    %28 = vector.extract %27[0, 0, 0] : f32 from vector<1x1x1xf32>
    %cst_7 = arith.constant 3.85802472E-4 : f32
    %29 = arith.mulf %28, %cst_7 : f32
    %c1_i32_8 = arith.constant 1 : i32
    %30 = vector.broadcast %c1_i32_8 : i32 to vector<1x972xi32>
    %31 = arith.cmpi eq, %20, %30 : vector<1x972xi32>
    %32 = arith.select %31, %3, %21 : vector<1x972xi1>, vector<1x972xf32>
    %33 = vector.shape_cast %32 : vector<1x972xf32> to vector<1x1x972xf32>
    %cst_9 = arith.constant dense<0.000000e+00> : vector<1xf32>
    %34 = vector.multi_reduction <add>, %33, %cst_9 [1, 2] : vector<1x1x972xf32> to vector<1xf32>
    %35 = vector.shape_cast %34 : vector<1xf32> to vector<1x1x1xf32>
    %36 = vector.extract %35[0, 0, 0] : f32 from vector<1x1x1xf32>
    %cst_10 = arith.constant 3.85802472E-4 : f32
    %37 = arith.mulf %36, %cst_10 : f32
    %c2_i32 = arith.constant 2 : i32
    %38 = vector.broadcast %c2_i32 : i32 to vector<1x972xi32>
    %39 = arith.cmpi eq, %20, %38 : vector<1x972xi32>
    %40 = arith.select %39, %3, %21 : vector<1x972xi1>, vector<1x972xf32>
    %41 = vector.shape_cast %40 : vector<1x972xf32> to vector<1x1x972xf32>
    %cst_11 = arith.constant dense<0.000000e+00> : vector<1xf32>
    %42 = vector.multi_reduction <add>, %41, %cst_11 [1, 2] : vector<1x1x972xf32> to vector<1xf32>
    %43 = vector.shape_cast %42 : vector<1xf32> to vector<1x1x1xf32>
    %44 = vector.extract %43[0, 0, 0] : f32 from vector<1x1x1xf32>
    %cst_12 = arith.constant 3.85802472E-4 : f32
    %45 = arith.mulf %44, %cst_12 : f32
    %46 = tpu.iota {dimensions = array<i32: 0>} : vector<6x256xi32>
    %c3_i32_13 = arith.constant 3 : i32
    %c0_i32_14 = arith.constant 0 : i32
    %47 = arith.cmpi eq, %c3_i32_13, %c0_i32_14 : i32
    %c1_i32_15 = arith.constant 1 : i32
    %48 = arith.select %47, %c1_i32_15, %c3_i32_13 : i32
    %49 = vector.broadcast %48 : i32 to vector<6x256xi32>
    %50 = arith.remsi %46, %49 : vector<6x256xi32>
    %c0_i32_16 = arith.constant 0 : i32
    %51 = vector.broadcast %c0_i32_16 : i32 to vector<6x256xi32>
    %52 = arith.cmpi ne, %50, %51 : vector<6x256xi32>
    %c0_i32_17 = arith.constant 0 : i32
    %53 = vector.broadcast %c0_i32_17 : i32 to vector<6x256xi32>
    %54 = arith.cmpi slt, %50, %53 : vector<6x256xi32>
    %c0_i32_18 = arith.constant 0 : i32
    %55 = arith.cmpi slt, %48, %c0_i32_18 : i32
    %56 = vector.broadcast %55 : i1 to vector<6x256xi1>
    %57 = vector.broadcast %56 : vector<6x256xi1> to vector<6x256xi1>
    %58 = arith.xori %54, %57 : vector<6x256xi1>
    %59 = arith.andi %58, %52 : vector<6x256xi1>
    %60 = vector.broadcast %48 : i32 to vector<6x256xi32>
    %61 = arith.addi %50, %60 : vector<6x256xi32>
    %62 = arith.select %59, %61, %50 : vector<6x256xi1>, vector<6x256xi32>
    %c0_i32_19 = arith.constant 0 : i32
    %63 = vector.broadcast %c0_i32_19 : i32 to vector<6x256xi32>
    %64 = arith.cmpi eq, %62, %63 : vector<6x256xi32>
    %c1_i32_20 = arith.constant 1 : i32
    %65 = vector.broadcast %c1_i32_20 : i32 to vector<6x256xi32>
    %66 = arith.cmpi eq, %62, %65 : vector<6x256xi32>
    %67 = vector.broadcast %37 : f32 to vector<6x256xf32>
    %68 = vector.broadcast %45 : f32 to vector<6x256xf32>
    %69 = arith.select %66, %67, %68 : vector<6x256xi1>, vector<6x256xf32>
    %70 = vector.broadcast %29 : f32 to vector<6x256xf32>
    %71 = arith.select %64, %70, %69 : vector<6x256xi1>, vector<6x256xf32>
    %c0_21 = arith.constant 0 : index
    %c0_22 = arith.constant 0 : index
    %72 = vector.load %arg1[%c0_21, %c0_22] : memref<6x256xf32, #tpu.memory_space<vmem>>, vector<6x256xf32>
    %73 = arith.subf %71, %72 : vector<6x256xf32>
    %74 = arith.mulf %73, %73 : vector<6x256xf32>
    %75 = vector.shape_cast %74 : vector<6x256xf32> to vector<1x6x256xf32>
    %cst_23 = arith.constant dense<0.000000e+00> : vector<1xf32>
    %76 = vector.multi_reduction <add>, %75, %cst_23 [1, 2] : vector<1x6x256xf32> to vector<1xf32>
    %77 = vector.shape_cast %76 : vector<1xf32> to vector<1x1x1xf32>
    %78 = vector.extract %77[0, 0, 0] : f32 from vector<1x1x1xf32>
    %cst_24 = arith.constant 5.000000e-01 : f32
    %79 = arith.mulf %cst_24, %78 : f32
    %c0_25 = arith.constant 0 : index
    %c0_26 = arith.constant 0 : index
    %80 = memref.load %arg2[%c0_25, %c0_26] : memref<1x1xf32, #tpu.memory_space<smem>>
    memref.store %79, %arg2[%c0_25, %c0_26] : memref<1x1xf32, #tpu.memory_space<smem>>
    return
  }
}

</mosaic_0001>

<bundles_post_ra>
// kernel: renderer_model_forward.1
= control target key start
LH: loop header
LB: loop body
LE: loop exit
PB: predicated region body
PF: predicated region fallthrough
CT: control target
= control target key end

     0   :  { %v78_v3 = vlaneseq  ;;  %s919_s0 = inlined_call_operand.vmem [shape: f32[8,972], index: 0, kind: input, shape index: {}]   ;;  %s920_s1 = inlined_call_operand.vmem [shape: f32[6,256], index: 1, kind: input, shape index: {}]   ;;  %s921_s2 = inlined_call_operand.hbm [shape: f32[1,1], index: 2, kind: output, shape index: {}]  }
   0x1   :  { %v12_v0 = vld [vmem:[%s919_s0] sm:$0xff]  ;;  %v13_v1 = vld [vmem:[%s919_s0 + $0x8] sm:$0xff]  ;;  %v14_v2 = vld [vmem:[%s919_s0 + $0x10] sm:$0xff] }
   0x2   :  { %v15_v4 = vld [vmem:[%s919_s0 + $0x18] sm:$0xff]  ;;  %574 = vtanh.f32 %v12_v0  ;;  %v16_v5 = vld [vmem:[%s919_s0 + $0x20] sm:$0xff]  ;;  %v637_v6 = vand.u32 127, %v78_v3 }
   0x3   :  { %576 = vtanh.f32 %v13_v1 }
   0x4   :  { %7 = vsyncpa [#allocation3], 0  ;;  %v17_v7 = vld [vmem:[%s919_s0 + $0x28] sm:$0xff]  ;;  %578 = vtanh.f32 %v14_v2  ;;  %v18_v8 = vld [vmem:[%s919_s0 + $0x30] sm:$0xff]  ;;  %vm70_vm0 = vcmask 621568   ;;  %v649_v10 = vadd.s32 128, %v637_v6 }
   0x5   :  { %580 = vtanh.f32 %v15_v4  ;;  %v19_v9 = vld [vmem:[%s919_s0 + $0x38] sm:$0xff]  ;;  %v652_v11 = vadd.s32 256, %v637_v6  ;;  %v655_v12 = vadd.s32 384, %v637_v6  ;;  %v90_v13 = vand.u32 65535, %v637_v6  ;;  %s554_s7 = sshll.u32 %s921_s2, 4  ;;  %s605_s10 = smov [#allocation2]   ;;  %s555_s7 = int_to_ptr.hbm [resolvable:$true] %s554_s7 }
   0x6   :  { %582 = vtanh.f32 %v16_v5  ;;  %v659_v15 = vadd.s32 512, %v637_v6  ;;  %v662_v16 = vadd.s32 640, %v637_v6  ;;  %v91_v17 = vshrl.u32 %v637_v6, 16 }
   0x7   :  { %584 = vtanh.f32 %v17_v7  ;;  %v666_v20 = vadd.s32 768, %v637_v6  ;;  %v668_v21 = vmul.u32 43690, %v90_v13  ;;  %v671_v24 = vadd.s32 896, %v637_v6 }
   0x8   :  { %v575_v14 = vpop.eup %574  ;;  %586 = vtanh.f32 %v18_v8  ;;  %v93_v25 = vmul.u32 43691, %v90_v13  ;;  %v119_v26 = vand.u32 65535, %v649_v10  ;;  %v120_v31 = vshrl.u32 %v649_v10, 16 }
   0x9   :  { %v577_v18 = vpop.eup %576  ;;  %588 = vtanh.f32 %v19_v9  ;;  %v28_v19 = vrot.slane %v575_v14, 4  ;;  %v97_v30 = vshll.u32 %v668_v21, 16  ;;  %v676_v35 = vmul.u32 43691, %v91_v17 }
   0xa   :  { %v579_v22 = vpop.eup %578  ;;  %v34_v23 = vrot.slane %v577_v18, 4  ;;  %v148_v36 = vand.u32 65535, %v652_v11  ;;  %v96_v41 = vmul.u32 43690, %v91_v17  ;;  %v604_v4 = vmov 0  }
   0xb   :  { %v581_v27 = vpop.eup %580  ;;  %v29_v28 = vadd.f32 %v575_v14, %v28_v19  ;;  %v40_v29 = vrot.slane %v579_v22, 4  ;;  %vm679_vm1 = vc.u32 %v93_v25, %v97_v30  ;;  %v99_v59 = vshll.u32 %v676_v35, 16 }
   0xc   :  { %v583_v32 = vpop.eup %582  ;;  %v35_v33 = vadd.f32 %v577_v18, %v34_v23  ;;  %v46_v34 = vrot.slane %v581_v27, 4  ;;  %v102_v5 = vsel %vm679_vm1, 1, %v604_v4  ;;  %v122_v13 = vmul.u32 43691, %v119_v26 }
   0xd   :  { %v585_v37 = vpop.eup %584  ;;  %v30_v38 = vrot.slane %v29_v28, 2  ;;  %v41_v39 = vadd.f32 %v579_v22, %v40_v29  ;;  %v52_v40 = vrot.slane %v583_v32, 4  ;;  %v98_v17 = vshrl.u32 %v668_v21, 16 }
   0xe   :  { %v587_v42 = vpop.eup %586  ;;  %v36_v43 = vrot.slane %v35_v33, 2  ;;  %v47_v44 = vadd.f32 %v581_v27, %v46_v34  ;;  %v58_v45 = vrot.slane %v585_v37, 4  ;;  %v100_v18 = vshrl.u32 %v676_v35, 16 }
   0xf   :  { %v589_v47 = vpop.eup %588  ;;  %v31_v48 = vadd.f32 %v30_v38, %v29_v28  ;;  %v42_v49 = vrot.slane %v41_v39, 2  ;;  %v53_v50 = vadd.f32 %v583_v32, %v52_v40  ;;  %v64_v51 = vrot.slane %v587_v42, 4 }
  0x10   :  { %v37_v52 = vadd.f32 %v36_v43, %v35_v33  ;;  %v48_v53 = vrot.slane %v47_v44, 2  ;;  %v59_v54 = vadd.f32 %v585_v37, %v58_v45  ;;  %v71_v55 = vsel %vm70_vm0, %v589_v47, 0.0 }
  0x11   :  { %v43_v56 = vadd.f32 %v42_v49, %v41_v39  ;;  %v54_v57 = vrot.slane %v53_v50, 2  ;;  %v65_v58 = vadd.f32 %v587_v42, %v64_v51  ;;  %v32_v60 = vrot.slane %v31_v48, 1 }
  0x12   :  { %v49_v61 = vadd.f32 %v48_v53, %v47_v44  ;;  %v60_v62 = vrot.slane %v59_v54, 2  ;;  %v72_v63 = vrot.slane %v71_v55, 4  ;;  %v38_v0 = vrot.slane %v37_v52, 1 }
  0x13   :  { %v44_v1 = vrot.slane %v43_v56, 1  ;;  %v66_v2 = vrot.slane %v65_v58, 2  ;;  %v688_v8 = vadd.f32 %v54_v57, %v53_v50  ;;  %v103_v19 = vadd.s32 %v97_v30, %v93_v25 }
  0x14   :  { %v50_v7 = vrot.slane %v49_v61, 1  ;;  %v73_v9 = vadd.f32 %v72_v63, %v71_v55  ;;  %v690_v14 = vadd.f32 %v60_v62, %v59_v54  ;;  %v694_v22 = vadd.f32 %v32_v60, %v31_v48 }
  0x15   :  { %v696_v23 = vadd.f32 %v66_v2, %v65_v58  ;;  %v104_v28 = vadd.s32 %v102_v5, %v96_v41  ;;  %v698_v29 = vadd.f32 %v38_v0, %v37_v52  ;;  %v700_v32 = vadd.f32 %v44_v1, %v43_v56 }
  0x16   :  { %v74_v27 = vrot.slane %v73_v9, 2  ;;  %vm105_vm2 = vc.u32 %v103_v19, %v99_v59  ;;  %v123_v33 = vmul.u32 43690, %v119_v26  ;;  %v702_v34 = vadd.f32 %v50_v7, %v49_v61 }
  0x17   :  { %v56_v37 = vrot.slane %v688_v8, 1  ;;  %v106_v21 = vsel %vm105_vm2, 1, %v604_v4  ;;  %v124_v35 = vmul.u32 43691, %v120_v31  ;;  %v62_v25 = vrot.slane %v690_v14, 1 }
  0x18   :  { %v108_v30 = vadd.s32 %v106_v21, %v104_v28  ;;  %v125_v38 = vmul.u32 43690, %v120_v31  ;;  %v126_v39 = vshll.u32 %v123_v33, 16  ;;  %v68_v40 = vrot.slane %v696_v23, 1 }
  0x19   :  { %v708_v41 = vadd.f32 %v74_v27, %v73_v9  ;;  %v127_v42 = vshrl.u32 %v123_v33, 16  ;;  %v128_v43 = vshll.u32 %v124_v35, 16  ;;  %v149_v45 = vshrl.u32 %v652_v11, 16 }
  0x1a   :  { %v109_v44 = vadd.s32 %v108_v30, %v98_v17  ;;  %vm130_vm3 = vc.u32 %v122_v13, %v126_v39  ;;  %v132_v26 = vadd.s32 %v126_v39, %v122_v13  ;;  %v129_v46 = vshrl.u32 %v124_v35, 16 }
  0x1b   :  { %v131_v47 = vsel %vm130_vm3, 1, %v604_v4  ;;  %v151_v48 = vmul.u32 43691, %v148_v36  ;;  %v152_v31 = vmul.u32 43690, %v148_v36  ;;  %v153_v51 = vmul.u32 43691, %v149_v45 }
  0x1c   :  { %v110_v49 = vadd.s32 %v109_v44, %v100_v18  ;;  %v133_v50 = vadd.s32 %v131_v47, %v125_v38  ;;  %vm134_vm4 = vc.u32 %v132_v26, %v128_v43  ;;  %v154_v53 = vmul.u32 43690, %v149_v45 }
  0x1d   :  { %v135_v52 = vsel %vm134_vm4, 1, %v604_v4  ;;  %v155_v54 = vshll.u32 %v152_v31, 16  ;;  %v156_v55 = vshrl.u32 %v152_v31, 16  ;;  %v157_v58 = vshll.u32 %v153_v51, 16 }
  0x1e   :  { %v111_v56 = vshrl.u32 %v110_v49, 1  ;;  %v137_v57 = vadd.s32 %v135_v52, %v133_v50  ;;  %v158_v59 = vshrl.u32 %v153_v51, 16  ;;  %v177_v61 = vand.u32 65535, %v655_v12 }
  0x1f   :  { %vm159_vm5 = vc.u32 %v151_v48, %v155_v54  ;;  %v161_v60 = vadd.s32 %v155_v54, %v151_v48  ;;  %v178_v62 = vshrl.u32 %v655_v12, 16  ;;  %v206_v1 = vand.u32 65535, %v659_v15 }
  0x20   :  { %v112_v36 = vmul.u32 3, %v111_v56  ;;  %v138_v63 = vadd.s32 %v137_v57, %v127_v42  ;;  %v160_v0 = vsel %vm159_vm5, 1, %v604_v4  ;;  %v180_v5 = vmul.u32 43691, %v177_v61 }
  0x21   :  { %v162_v2 = vadd.s32 %v160_v0, %v154_v53  ;;  %vm163_vm6 = vc.u32 %v161_v60, %v157_v58  ;;  %v181_v7 = vmul.u32 43690, %v177_v61  ;;  %v182_v18 = vmul.u32 43691, %v178_v62 }
  0x22   :  { %v722_v9 = vsub.s32 %v637_v6, %v112_v36  ;;  %v139_v13 = vadd.s32 %v138_v63, %v129_v46  ;;  %v164_v17 = vsel %vm163_vm6, 1, %v604_v4  ;;  %v183_v27 = vmul.u32 43690, %v178_v62 }
  0x23   :  { %v166_v19 = vadd.s32 %v164_v17, %v162_v2  ;;  %v184_v28 = vshll.u32 %v181_v7, 16  ;;  %v185_v33 = vshrl.u32 %v181_v7, 16  ;;  %v186_v35 = vshll.u32 %v182_v18, 16 }
  0x24   :  { %v140_v21 = vshrl.u32 %v139_v13, 1  ;;  %v187_v30 = vshrl.u32 %v182_v18, 16  ;;  %v207_v38 = vshrl.u32 %v659_v15, 16  ;;  %v209_v43 = vmul.u32 43691, %v206_v1 }
  0x25   :  { %v167_v39 = vadd.s32 %v166_v19, %v156_v55  ;;  %vm188_vm7 = vc.u32 %v180_v5, %v184_v28  ;;  %v190_v42 = vadd.s32 %v184_v28, %v180_v5  ;;  %v210_v26 = vmul.u32 43690, %v206_v1 }
  0x26   :  { %v141_v44 = vmul.u32 3, %v140_v21  ;;  %v189_v6 = vsel %vm188_vm7, 1, %v604_v4  ;;  %v211_v45 = vmul.u32 43691, %v207_v38  ;;  %v212_v48 = vmul.u32 43690, %v207_v38 }
  0x27   :  { %v168_v46 = vadd.s32 %v167_v39, %v158_v59  ;;  %v191_v47 = vadd.s32 %v189_v6, %v183_v27  ;;  %vm192_vm8 = vc.u32 %v190_v42, %v186_v35  ;;  %v213_v50 = vshll.u32 %v210_v26, 16 }
  0x28   :  { %v728_v31 = vsub.s32 %v649_v10, %v141_v44  ;;  %v193_v49 = vsel %vm192_vm8, 1, %v604_v4  ;;  %v214_v51 = vshrl.u32 %v210_v26, 16  ;;  %v215_v54 = vshll.u32 %v211_v45, 16 }
  0x29   :  { %v169_v52 = vshrl.u32 %v168_v46, 1  ;;  %v195_v53 = vadd.s32 %v193_v49, %v191_v47  ;;  %v216_v55 = vshrl.u32 %v211_v45, 16  ;;  %vm217_vm9 = vc.u32 %v209_v43, %v213_v50 }
  0x2a   :  { %v219_v56 = vadd.s32 %v213_v50, %v209_v43  ;;  %v235_v57 = vand.u32 65535, %v662_v16  ;;  %v236_v58 = vshrl.u32 %v662_v16, 16  ;;  %v218_v61 = vsel %vm217_vm9, 1, %v604_v4 }
  0x2b   :  { %v170_v59 = vmul.u32 3, %v169_v52  ;;  %v196_v60 = vadd.s32 %v195_v53, %v185_v33  ;;  %v264_v10 = vand.u32 65535, %v666_v20  ;;  %v220_v62 = vadd.s32 %v218_v61, %v212_v48 }
  0x2c   :  { %vm221_vm10 = vc.u32 %v219_v56, %v215_v54  ;;  %v238_v36 = vmul.u32 43691, %v235_v57  ;;  %v239_v63 = vmul.u32 43690, %v235_v57  ;;  %v240_v5 = vmul.u32 43691, %v236_v58 }
  0x2d   :  { %v736_v0 = vsub.s32 %v652_v11, %v170_v59  ;;  %v197_v1 = vadd.s32 %v196_v60, %v187_v30  ;;  %v222_v2 = vsel %vm221_vm10, 1, %v604_v4  ;;  %v241_v13 = vmul.u32 43690, %v236_v58 }
  0x2e   :  { %v224_v7 = vadd.s32 %v222_v2, %v220_v62  ;;  %v242_v17 = vshll.u32 %v239_v63, 16  ;;  %v243_v18 = vshrl.u32 %v239_v63, 16  ;;  %v244_v27 = vshll.u32 %v240_v5, 16 }
  0x2f   :  { %v198_v19 = vshrl.u32 %v197_v1, 1  ;;  %v245_v28 = vshrl.u32 %v240_v5, 16  ;;  %v265_v33 = vshrl.u32 %v666_v20, 16  ;;  %v267_v38 = vmul.u32 43691, %v264_v10 }
  0x30   :  { %v225_v21 = vadd.s32 %v224_v7, %v214_v51  ;;  %vm246_vm11 = vc.u32 %v238_v36, %v242_v17  ;;  %v248_v35 = vadd.s32 %v242_v17, %v238_v36  ;;  %v268_v30 = vmul.u32 43690, %v264_v10 }
  0x31   :  { %v199_v39 = vmul.u32 3, %v198_v19  ;;  %v247_v11 = vsel %vm246_vm11, 1, %v604_v4  ;;  %v269_v42 = vmul.u32 43691, %v265_v33  ;;  %v270_v6 = vmul.u32 43690, %v265_v33 }
  0x32   :  { %v226_v43 = vadd.s32 %v225_v21, %v216_v55  ;;  %v249_v44 = vadd.s32 %v247_v11, %v241_v13  ;;  %vm250_vm12 = vc.u32 %v248_v35, %v244_v27  ;;  %v271_v46 = vshll.u32 %v268_v30, 16 }
  0x33   :  { %v742_v26 = vsub.s32 %v655_v12, %v199_v39  ;;  %v251_v45 = vsel %vm250_vm12, 1, %v604_v4  ;;  %v272_v47 = vshrl.u32 %v268_v30, 16  ;;  %v273_v50 = vshll.u32 %v269_v42, 16 }
  0x34   :  { %v227_v48 = vshrl.u32 %v226_v43, 1  ;;  %v253_v49 = vadd.s32 %v251_v45, %v249_v44  ;;  %v274_v51 = vshrl.u32 %v269_v42, 16  ;;  %vm275_vm13 = vc.u32 %v267_v38, %v271_v46 }
  0x35   :  { %v277_v52 = vadd.s32 %v271_v46, %v267_v38  ;;  %v293_v53 = vand.u32 65535, %v671_v24  ;;  %v294_v54 = vshrl.u32 %v671_v24, 16  ;;  %v276_v57 = vsel %vm275_vm13, 1, %v604_v4 }
  0x36   :  { %v228_v55 = vmul.u32 3, %v227_v48  ;;  %v254_v56 = vadd.s32 %v253_v49, %v243_v18  ;;  %vm319_vm14 = vcmp.ne.s32.totalorder %v722_v9, 0  ;;  %v278_v12 = vadd.s32 %v276_v57, %v270_v6 }
  0x37   :  { %vm279_vm15 = vc.u32 %v277_v52, %v273_v50  ;;  %v296_v58 = vmul.u32 43691, %v293_v53  ;;  %v297_v59 = vmul.u32 43690, %v293_v53  ;;  %v298_v62 = vmul.u32 43691, %v294_v54 }
  0x38   :  { %v229_v60 = vsub.s32 %v659_v15, %v228_v55  ;;  %v255_v61 = vadd.s32 %v254_v56, %v245_v28  ;;  %v280_v10 = vsel %vm279_vm15, 1, %v604_v4  ;;  %v299_v63 = vmul.u32 43690, %v294_v54 }
  0x39   :  { %v282_v36 = vadd.s32 %v280_v10, %v278_v12  ;;  %v300_v1 = vshll.u32 %v297_v59, 16  ;;  %v301_v2 = vshrl.u32 %v297_v59, 16  ;;  %v302_v7 = vshll.u32 %v298_v62, 16 }
  0x3a   :  { %v256_v5 = vshrl.u32 %v255_v61, 1  ;;  %v303_v13 = vshrl.u32 %v298_v62, 16  ;;  %vm320_vm0 = vcmp.ne.s32.totalorder %v728_v31, 0  ;;  %vm321_vm2 = vcmp.ne.s32.totalorder %v736_v0, 0 }
  0x3b   :  { %v283_v17 = vadd.s32 %v282_v36, %v272_v47  ;;  %vm304_vm1 = vc.u32 %v296_v58, %v300_v1  ;;  %v306_v18 = vadd.s32 %v300_v1, %v296_v58  ;;  %vm322_vm3 = vcmp.ne.s32.totalorder %v742_v26, 0 }
  0x3c   :  { %v257_v19 = vmul.u32 3, %v256_v5  ;;  %v305_v15 = vsel %vm304_vm1, 1, %v604_v4  ;;  %vm323_vm4 = vcmp.ne.s32.totalorder %v229_v60, 0  ;;  %vm327_vm6 = vcmp.lt.s32.totalorder %v722_v9, 0 }
  0x3d   :  { %v284_v27 = vadd.s32 %v283_v17, %v274_v51  ;;  %v307_v28 = vadd.s32 %v305_v15, %v299_v63  ;;  %vm308_vm5 = vc.u32 %v306_v18, %v302_v7  ;;  %vm328_vm7 = vcmp.lt.s32.totalorder %v728_v31, 0  ;;  %vm762_vm9 = vmand %vm327_vm6, %vm319_vm14 }
  0x3e   :  { %v258_v33 = vsub.s32 %v662_v16, %v257_v19  ;;  %v309_v21 = vsel %vm308_vm5, 1, %v604_v4  ;;  %vm329_vm8 = vcmp.lt.s32.totalorder %v736_v0, 0  ;;  %vm330_vm10 = vcmp.lt.s32.totalorder %v742_v26, 0  ;;  %vm336_vm12 = vmand %vm328_vm7, %vm320_vm0 }
  0x3f   :  { %v285_v38 = vshrl.u32 %v284_v27, 1  ;;  %v311_v39 = vadd.s32 %v309_v21, %v307_v28  ;;  %vm331_vm11 = vcmp.lt.s32.totalorder %v229_v60, 0  ;;  %vm771_vm1 = vmand %vm329_vm8, %vm321_vm2  ;;  %v343_v11 = vadd.s32 3, %v722_v9 }
  0x40   :  { %vm324_vm13 = vcmp.ne.s32.totalorder %v258_v33, 0  ;;  %vm332_vm15 = vcmp.lt.s32.totalorder %v258_v33, 0  ;;  %v344_v30 = vadd.s32 3, %v728_v31  ;;  %vm338_vm14 = vmand %vm330_vm10, %vm322_vm3  ;;  %v345_v44 = vadd.s32 3, %v736_v0 }
  0x41   :  { %v286_v42 = vmul.u32 3, %v285_v38  ;;  %v312_v43 = vadd.s32 %v311_v39, %v301_v2  ;;  %v346_v6 = vadd.s32 3, %v742_v26  ;;  %vm339_vm0 = vmand %vm331_vm11, %vm323_vm4  ;;  %v347_v45 = vadd.s32 3, %v229_v60 }
  0x42   :  { %v348_v46 = vadd.s32 3, %v258_v33  ;;  %v785_v47 = vsel %vm762_vm9, %v343_v11, %v722_v9  ;;  %v788_v48 = vsel %vm336_vm12, %v344_v30, %v728_v31  ;;  %vm340_vm2 = vmand %vm332_vm15, %vm324_vm13  ;;  %v796_v51 = vsel %vm771_vm1, %v345_v44, %v736_v0 }
  0x43   :  { %v287_v49 = vsub.s32 %v666_v20, %v286_v42  ;;  %v313_v50 = vadd.s32 %v312_v43, %v303_v13  ;;  %v799_v52 = vsel %vm338_vm14, %v346_v6, %v742_v26  ;;  %v801_v53 = vsel %vm339_vm0, %v347_v45, %v229_v60 }
  0x44   :  { %v803_v9 = vsel %vm340_vm2, %v348_v46, %v258_v33  ;;  %vm359_vm3 = vcmp.eq.s32.totalorder %v785_v47, 0  ;;  %vm360_vm4 = vcmp.eq.s32.totalorder %v788_v48, 0  ;;  %v810_v0 = vadd.f32 %v56_v37, %v688_v8 }
  0x45   :  { %v314_v20 = vshrl.u32 %v313_v50, 1  ;;  %vm325_vm5 = vcmp.ne.s32.totalorder %v287_v49, 0  ;;  %vm333_vm6 = vcmp.lt.s32.totalorder %v287_v49, 0  ;;  %v349_v31 = vadd.s32 3, %v287_v49 }
  0x46   :  { %v815_v26 = vadd.f32 %v62_v25, %v690_v14  ;;  %vm341_vm7 = vmand %vm333_vm6, %vm325_vm5  ;;  %vm361_vm8 = vcmp.eq.s32.totalorder %v796_v51, 0  ;;  %vm362_vm9 = vcmp.eq.s32.totalorder %v799_v52, 0  ;;  %vm363_vm10 = vcmp.eq.s32.totalorder %v801_v53, 0 }
  0x47   :  { %v315_v54 = vmul.u32 3, %v314_v20  ;;  %v367_v55 = vsel %vm359_vm3, %v694_v22, 0.0  ;;  %v368_v56 = vsel %vm360_vm4, %v698_v29, 0.0  ;;  %v825_v8 = vadd.f32 %v68_v40, %v696_v23 }
  0x48   :  { %v76_v14 = vrot.slane %v708_v41, 1  ;;  %vm364_vm11 = vcmp.eq.s32.totalorder %v803_v9, 0  ;;  %v369_v37 = vsel %vm361_vm8, %v700_v32, 0.0  ;;  %v831_v57 = vsel %vm341_vm7, %v349_v31, %v287_v49 }
  0x49   :  { %v316_v25 = vsub.s32 %v671_v24, %v315_v54  ;;  %v370_v12 = vsel %vm362_vm9, %v702_v34, 0.0  ;;  %vm375_vm12 = vcmask 1040384   ;;  %v371_v58 = vsel %vm363_vm10, %v810_v0, 0.0 }
  0x4a   :  { %v376_v59 = vsel %vm375_vm12, %v367_v55, 0.0  ;;  %v377_v23 = vsel %vm375_vm12, %v368_v56, 0.0  ;;  %v379_v40 = vsel %vm375_vm12, %v369_v37, 0.0  ;;  %v839_v10 = vadd.f32 %v76_v14, %v708_v41 }
  0x4b   :  { %vm326_vm13 = vcmp.ne.s32.totalorder %v316_v25, 0  ;;  %vm334_vm15 = vcmp.lt.s32.totalorder %v316_v25, 0  ;;  %v350_v60 = vadd.s32 3, %v316_v25  ;;  %v378_v61 = vadd.f32 %v377_v23, %v376_v59 }
  0x4c   :  { %vm342_vm1 = vmand %vm334_vm15, %vm326_vm13  ;;  %vm365_vm14 = vcmp.eq.s32.totalorder %v831_v57, 0  ;;  %v372_v24 = vsel %vm364_vm11, %v815_v26, 0.0  ;;  %v381_v62 = vsel %vm375_vm12, %v370_v12, 0.0  ;;  %vm443_vm0 = vcmp.eq.s32.totalorder %v785_v47, 2 }
  0x4d   :  { %v846_v36 = vsel %vm342_vm1, %v350_v60, %v316_v25  ;;  %v380_v63 = vadd.f32 %v379_v40, %v378_v61  ;;  %vm444_vm2 = vcmp.eq.s32.totalorder %v788_v48, 2  ;;  %v383_v41 = vsel %vm375_vm12, %v371_v58, 0.0 }
  0x4e   :  { %vm366_vm3 = vcmp.eq.s32.totalorder %v846_v36, 0  ;;  %vm445_vm4 = vcmp.eq.s32.totalorder %v796_v51, 2  ;;  %v373_v1 = vsel %vm365_vm14, %v825_v8, 0.0  ;;  %vm446_vm5 = vcmp.eq.s32.totalorder %v799_v52, 2 }
  0x4f   :  { %v382_v2 = vadd.f32 %v381_v62, %v380_v63  ;;  %v385_v5 = vsel %vm375_vm12, %v372_v24, 0.0  ;;  %vm389_vm6 = vcmask 614400   ;;  %v451_v7 = vsel %vm443_vm0, %v694_v22, 0.0 }
  0x50   :  { %v452_v13 = vsel %vm444_vm2, %v698_v29, 0.0  ;;  %v374_v17 = vsel %vm366_vm3, %v839_v10, 0.0  ;;  %vm447_vm7 = vcmp.eq.s32.totalorder %v801_v53, 2  ;;  %v453_v19 = vsel %vm445_vm4, %v700_v32, 0.0 }
  0x51   :  { %v384_v18 = vadd.f32 %v383_v41, %v382_v2  ;;  %v387_v15 = vsel %vm375_vm12, %v373_v1, 0.0  ;;  %vm448_vm8 = vcmp.eq.s32.totalorder %v803_v9, 2  ;;  %v454_v27 = vsel %vm446_vm5, %v702_v34, 0.0 }
  0x52   :  { %v459_v28 = vsel %vm375_vm12, %v451_v7, 0.0  ;;  %vm449_vm9 = vcmp.eq.s32.totalorder %v831_v57, 2  ;;  %v460_v21 = vsel %vm375_vm12, %v452_v13, 0.0  ;;  %v462_v35 = vsel %vm375_vm12, %v453_v19, 0.0 }
  0x53   :  { %v386_v33 = vadd.f32 %v385_v5, %v384_v18  ;;  %v390_v38 = vsel %vm389_vm6, %v374_v17, 0.0  ;;  %vm450_vm10 = vcmp.eq.s32.totalorder %v846_v36, 2  ;;  %v455_v39 = vsel %vm447_vm7, %v810_v0, 0.0 }
  0x54   :  { %v461_v16 = vadd.f32 %v460_v21, %v459_v28  ;;  %v464_v30 = vsel %vm375_vm12, %v454_v27, 0.0  ;;  %vm402_vm11 = vcmp.eq.s32.totalorder %v785_v47, 1  ;;  %vm403_vm13 = vcmp.eq.s32.totalorder %v788_v48, 1 }
  0x55   :  { %v388_v11 = vadd.f32 %v387_v15, %v386_v33  ;;  %v456_v42 = vsel %vm448_vm8, %v815_v26, 0.0  ;;  %vm404_vm15 = vcmp.eq.s32.totalorder %v796_v51, 1  ;;  %vm405_vm1 = vcmp.eq.s32.totalorder %v799_v52, 1 }
  0x56   :  { %v463_v43 = vadd.f32 %v462_v35, %v461_v16  ;;  %v457_v6 = vsel %vm449_vm9, %v825_v8, 0.0  ;;  %v466_v45 = vsel %vm375_vm12, %v455_v39, 0.0  ;;  %vm406_vm14 = vcmp.eq.s32.totalorder %v801_v53, 1 }
  0x57   :  { %v391_v44 = vadd.f32 %v390_v38, %v388_v11  ;;  %v410_v47 = vsel %vm402_vm11, %v694_v22, 0.0  ;;  %v411_v48 = vsel %vm403_vm13, %v698_v29, 0.0  ;;  %v412_v49 = vsel %vm404_vm15, %v700_v32, 0.0 }
  0x58   :  { %v465_v46 = vadd.f32 %v464_v30, %v463_v43  ;;  %v458_v50 = vsel %vm450_vm10, %v839_v10, 0.0  ;;  %v468_v51 = vsel %vm375_vm12, %v456_v42, 0.0  ;;  %v413_v52 = vsel %vm405_vm1, %v702_v34, 0.0 }
  0x59   :  { %392 = vadd.xlane.f32.xlu0 %v391_v44  ;;  %vm407_vm0 = vcmp.eq.s32.totalorder %v803_v9, 1  ;;  %v418_v53 = vsel %vm375_vm12, %v410_v47, 0.0  ;;  %v419_v22 = vsel %vm375_vm12, %v411_v48, 0.0  ;;  %v470_v29 = vsel %vm375_vm12, %v457_v6, 0.0 }
  0x5a   :  { %v467_v20 = vadd.f32 %v466_v45, %v465_v46  ;;  %v414_v32 = vsel %vm406_vm14, %v810_v0, 0.0  ;;  %v420_v31 = vadd.f32 %v419_v22, %v418_v53  ;;  %v421_v54 = vsel %vm375_vm12, %v412_v49, 0.0 }
  0x5b   :  { %vm408_vm2 = vcmp.eq.s32.totalorder %v831_v57, 1  ;;  %v423_v56 = vsel %vm375_vm12, %v413_v52, 0.0  ;;  %v472_v34 = vsel %vm389_vm6, %v458_v50, 0.0  ;;  %v415_v9 = vsel %vm407_vm0, %v815_v26, 0.0 }
  0x5c   :  { %v469_v55 = vadd.f32 %v468_v51, %v467_v20  ;;  %v422_v14 = vadd.f32 %v421_v54, %v420_v31  ;;  %vm409_vm3 = vcmp.eq.s32.totalorder %v846_v36, 1  ;;  %v425_v25 = vsel %vm375_vm12, %v414_v32, 0.0 }
  0x5d   :  { %v416_v0 = vsel %vm408_vm2, %v825_v8, 0.0  ;;  %v427_v59 = vsel %vm375_vm12, %v415_v9, 0.0  ;;  %v417_v57 = vsel %vm409_vm3, %v839_v10, 0.0  ;;  %v485_v33 = vshrl.u32 %v78_v3, 7 }
  0x5e   :  { %v471_v37 = vadd.f32 %v470_v29, %v469_v55  ;;  %v424_v12 = vadd.f32 %v423_v56, %v422_v14  ;;  %v429_v40 = vsel %vm375_vm12, %v416_v0, 0.0  ;;  %v431_v26 = vsel %vm389_vm6, %v417_v57, 0.0  ;;  %v527_v55 = vld [vmem:[%s920_s1] sm:$0x3f]  ;;  %v528_v56 = vld [vmem:[%s920_s1 + $0x8] sm:$0x3f] }
  0x5f   :  { %v489_v38 = vand.u32 65535, %v485_v33  ;;  %v490_v11 = vshrl.u32 %v485_v33, 16  ;;  %vm533_vm10 = vcmask 1045504  }
  0x60   :  { %v473_v58 = vadd.f32 %v472_v34, %v471_v37  ;;  %v426_v23 = vadd.f32 %v425_v25, %v424_v12 }
  0x61   :  { %v493_v30 = vmul.u32 43690, %v489_v38  ;;  %v492_v42 = vmul.u32 43691, %v489_v38  ;;  %v494_v43 = vmul.u32 43691, %v490_v11  ;;  %v495_v46 = vmul.u32 43690, %v490_v11 }
  0x62   :  { %474 = vadd.xlane.f32.xlu1 %v473_v58  ;;  %v428_v60 = vadd.f32 %v427_v59, %v426_v23 }
  0x63   :  { %v496_v44 = vshll.u32 %v493_v30, 16  ;;  %v498_v6 = vshll.u32 %v494_v43, 16  ;;  %v497_v49 = vshrl.u32 %v493_v30, 16  ;;  %v499_v51 = vshrl.u32 %v494_v43, 16 }
  0x64   :  { %v430_v61 = vadd.f32 %v429_v40, %v428_v60 }
  0x65   :  { %vm500_vm12 = vc.u32 %v492_v42, %v496_v44  ;;  %v502_v45 = vadd.s32 %v496_v44, %v492_v42 }
  0x66   :  { %v432_v24 = vadd.f32 %v431_v26, %v430_v61  ;;  %v501_v47 = vsel %vm500_vm12, 1, %v604_v4 }
  0x67   :  { %vm504_vm4 = vc.u32 %v502_v45, %v498_v6  ;;  %v503_v3 = vadd.s32 %v501_v47, %v495_v46 }
  0x68   :  { %433 = vadd.xlane.f32.xlu0 %v432_v24  ;;  %v505_v48 = vsel %vm504_vm4, 1, %v604_v4 }
  0x69   :  { %v507_v50 = vadd.s32 %v505_v48, %v503_v3 }
  0x6b   :  { %v508_v52 = vadd.s32 %v507_v50, %v497_v49 }
  0x6d   :  { %v509_v20 = vadd.s32 %v508_v52, %v499_v51 }
  0x6f   :  { %v510_v53 = vshrl.u32 %v509_v20, 1 }
  0x71   :  { %v511_v22 = vmul.u32 3, %v510_v53 }
  0x73   :  { %v512_v29 = vsub.s32 %v485_v33, %v511_v22 }
  0x75   :  { %vm515_vm5 = vcmp.ne.s32.totalorder %v512_v29, 0  ;;  %vm516_vm6 = vcmp.lt.s32.totalorder %v512_v29, 0  ;;  %v518_v32 = vadd.s32 3, %v512_v29 }
  0x76   :  { %vm517_vm7 = vmand %vm516_vm6, %vm515_vm5 }
  0x77   :  { %v519_v31 = vsel %vm517_vm7, %v518_v32, %v512_v29 }
  0x78   :  { %vm521_vm8 = vcmp.eq.s32.totalorder %v519_v31, 1  ;;  %vm520_vm9 = vcmp.eq.s32.totalorder %v519_v31, 0 }
  0xcc   :  { %v393_v62 = vpop.xlane.xlu0 %392 }
  0xcd   :  { %v394_v36 = vrot.slane %v393_v62, 4 }
  0xcf   :  { %v395_v63 = vadd.f32 %v394_v36, %v393_v62 }
  0xd1   :  { %v396_v8 = vrot.slane %v395_v63, 2 }
  0xd3   :  { %v397_v41 = vadd.f32 %v396_v8, %v395_v63 }
  0xd5   :  { %v475_v1 = vpop.xlane.xlu1 %474  ;;  %v398_v2 = vrot.slane %v397_v41, 1 }
  0xd6   :  { %v476_v5 = vrot.slane %v475_v1, 4 }
  0xd7   :  { %v399_v7 = vadd.f32 %v398_v2, %v397_v41 }
  0xd8   :  { %v477_v10 = vadd.f32 %v476_v5, %v475_v1 }
  0xd9   :  { %564 = vpush %v399_v7 }
  0xda   :  { %v478_v13 = vrot.slane %v477_v10, 2 }
  0xdb   :  { %v434_v17 = vpop.xlane.xlu0 %433 }
  0xdc   :  { %v435_v18 = vrot.slane %v434_v17, 4  ;;  %v479_v15 = vadd.f32 %v478_v13, %v477_v10 }
  0xde   :  { %v436_v19 = vadd.f32 %v435_v18, %v434_v17  ;;  %v480_v21 = vrot.slane %v479_v15, 1 }
  0xe0   :  { %v437_v27 = vrot.slane %v436_v19, 2  ;;  %v481_v16 = vadd.f32 %v480_v21, %v479_v15 }
  0xe2   :  { %v438_v28 = vadd.f32 %v437_v27, %v436_v19 }
  0xe4   :  { %v439_v35 = vrot.slane %v438_v28, 1 }
  0xe6   :  { %v440_v39 = vadd.f32 %v439_v35, %v438_v28 }
  0xe8   :  { %566 = vpush %v440_v39 }
  0xe9   :  { %568 = vpush %v481_v16 }
 0x10a   :  { %s565_s0 = spop %564 }
 0x10b   :  { %s401_s25 = smul.f32 0.00038580247, %s565_s0 }
 0x10d   :  { %v525_v34 = vstv %s401_s25 }
 0x119   :  { %s567_s26 = spop %566 }
 0x11a   :  { %s442_s27 = smul.f32 0.00038580247, %s567_s26  ;;  %s569_s28 = spop %568 }
 0x11b   :  { %s483_s29 = smul.f32 0.00038580247, %s569_s28 }
 0x11c   :  { %v522_v4 = vstv %s442_s27 }
 0x11d   :  { %v523_v54 = vstv %s483_s29 }
 0x11e   :  { %v524_v9 = vsel %vm521_vm8, %v522_v4, %v523_v54 }
 0x11f   :  { %v526_v14 = vsel %vm520_vm9, %v525_v34, %v524_v9 }
 0x120   :  { %v529_v37 = vsub.f32 %v526_v14, %v527_v55  ;;  %v530_v25 = vsub.f32 %v526_v14, %v528_v56 }
 0x122   :  { %v531_v0 = vmul.f32 %v529_v37, %v529_v37  ;;  %v532_v12 = vmul.f32 %v530_v25, %v530_v25 }
 0x124   :  { %v534_v58 = vsel %vm533_vm10, %v531_v0, 0.0  ;;  %v535_v59 = vsel %vm533_vm10, %v532_v12, 0.0 }
 0x125   :  { %v536_v57 = vadd.f32 %v535_v59, %v534_v58 }
 0x127   :  { %537 = vadd.xlane.f32.xlu1 %v536_v57 }
 0x19a   :  { %v538_v23 = vpop.xlane.xlu1 %537 }
 0x19b   :  { %v539_v40 = vrot.slane %v538_v23, 4 }
 0x19d   :  { %v540_v60 = vadd.f32 %v539_v40, %v538_v23 }
 0x19f   :  { %v541_v26 = vrot.slane %v540_v60, 2 }
 0x1a1   :  { %v542_v61 = vadd.f32 %v541_v26, %v540_v60 }
 0x1a3   :  { %v543_v24 = vrot.slane %v542_v61, 1 }
 0x1a5   :  { %v544_v62 = vadd.f32 %v543_v24, %v542_v61 }
 0x1a7   :  { %570 = vpush %v544_v62 }
 0x1d8   :  { %s571_s8 = spop %570 }
 0x1d9   :  { %s546_s9 = smul.f32 0.5, %s571_s8 }
 0x1db   :  { %548 = sst [smem:[#allocation2]] %s546_s9 }
 0x1dc   :  { %557 = dma.smem_to_hbm %s605_s10, 16, %s555_s7, [#allocation3]  }
 0x1dd   :  { %602 = dma.done.wait [#allocation3], 16  }
 0x1de   :  { %603 = vsyncadd [#allocation3], 4294967280 }
 0x1df   :  { %562 = sfence }
 0x1e0   :  { %563 = vsyncpa [#allocation3], 1 }

</bundles_post_ra>
